<compile_context>
chip_gen: v7x
topology: tpu7x:2x2x1
jax: 0.10.0
libtpu: 0.0.40
codegen_flags: <defaults>
</compile_context>

<pallas_src>
import numpy as np
import jax
import jax.numpy as jnp
from jax import lax
from jax.experimental import pallas as pl
from jax.experimental.pallas import tpu as pltpu

HEADS1 = 2                 # conv1 heads
C1 = 8                     # conv1 out channels per head
C2 = 8                     # conv2 out channels (heads=1)
FC1_HIDDEN = 16
NUM_CLASSES = 3
NODES_PER_GRAPH = 10
NUM_GRAPHS = 2
N = NODES_PER_GRAPH * NUM_GRAPHS
OUT_PAD = 128              # lane-dense final output; sliced to NUM_CLASSES in wrapper
NEG_SLOPE = 0.2
MASK_BIAS = -1e9

W1A = HEADS1 * C1 + 1      # conv1 augmented width (16 data lanes + 1 ones lane)
W2A = C2 + 1               # conv2 augmented width (8 data lanes + 1 ones lane)

# ---- packed-parameter buffer layout (rows of a (P_ROWS, 128) f32 array) ----
ROW_W1    = 0     # (1, 16)  conv1 projection (in_channels == 1)
ROW_ONE1  = 8     # (1, 17)  ones-column constant for layer-1 augmentation
ROW_AS1   = 16    # (2, 16)  att_src, head-block layout
ROW_AD1   = 24    # (2, 16)  att_dst, head-block layout
ROW_B1    = 32    # (1, 16)
ROW_MASK1 = 40    # (2, 17)  per-head lane masks (head lanes + ones lane)
ROW_W2    = 48    # (16, 8)
ROW_ONE2  = 64    # (1, 9)   ones-column constant for layer-2 augmentation
ROW_AS2   = 72    # (1, 8)
ROW_AD2   = 80    # (1, 8)
ROW_B2    = 88    # (1, 8)
ROW_REP   = 96    # (8, 128) lane-repeat of each channel FC1_HIDDEN times
ROW_WEXP  = 104   # (20, 128) fc1_w[(n%10)*8+c, k] at lane c*16+k of row n
ROW_FOLD  = 128   # (128, 16) sums the channel axis back out
ROW_SEG   = 256   # (2, 20)  graph segment-sum matrix
ROW_FC1B  = 264   # (1, 16)
ROW_FC2W  = 272   # (16, 128) fc2 weights zero-padded to 128 output lanes
ROW_FC2B  = 288   # (1, 128)
ROW_ADJB  = 296   # (20, 20) additive edge mask (0 on edges, -1e9 off)
P_ROWS    = 320


def _gat_layer(h_aug, att_src, att_dst, bias, adj_bias, head_masks=None):
    """One GATConv on augmented features h_aug (N, W+1), last lane == 1.

    att_src/att_dst: (H, W+1) head-block layout (augmentation lane is zero).
    bias: (1, W).  adj_bias: (N, N) additive mask.  head_masks: (H, W+1) or
    None — selects the head's own lanes plus the ones lane.
    """
    num_heads = att_src.shape[0]
    width = h_aug.shape[1] - 1
    # All per-head logit dots collapsed into 2 matmuls, one per orientation.
    src_all = lax.dot_general(att_src, h_aug, (((1,), (1,)), ((), ())),
                              preferred_element_type=jnp.float32)        # (H, N)
    dst_all = lax.dot_general(h_aug, att_dst, (((1,), (1,)), ((), ())),
                              preferred_element_type=jnp.float32)        # (N, H)

    out = jnp.zeros((h_aug.shape[0], width), jnp.float32)
    for hd in range(num_heads):
        e = dst_all[:, hd:hd + 1] + src_all[hd:hd + 1, :]                 # (N, N) e[i,j]
        e = jnp.where(e >= 0, e, NEG_SLOPE * e) + adj_bias                # LeakyReLU + mask
        m = jnp.max(e, axis=1, keepdims=True)
        p = jnp.exp(e - m)
        h_hd = h_aug if head_masks is None else h_aug * head_masks[hd:hd + 1, :]
        # Fused aggregation: last column of o is the softmax denominator.
        o = jnp.dot(p, h_hd, preferred_element_type=jnp.float32)         # (N, W+1)
        inv_s = pl.reciprocal(o[:, width:width + 1], approx=True)        # EUP slot
        out = out + inv_s * o[:, :width]                                  # head's own lanes only
    return out + bias


def gat_fused_kernel(x_ref, p_ref, out_ref):
    f32 = jnp.float32
    adj_bias = p_ref[ROW_ADJB:ROW_ADJB + N, 0:N]                          # (N, N)

    # ---- conv1 (+ReLU). in_channels == 1 -> projection is a VPU broadcast
    # multiply; the ones lane is appended via packed constants (no relayout).
    h1a = (x_ref[...] * p_ref[ROW_W1:ROW_W1 + 1, 0:W1A]
           + p_ref[ROW_ONE1:ROW_ONE1 + 1, 0:W1A])                         # (N, 17)
    h1 = jnp.maximum(
        _gat_layer(h1a,
                   p_ref[ROW_AS1:ROW_AS1 + HEADS1, 0:W1A],
                   p_ref[ROW_AD1:ROW_AD1 + HEADS1, 0:W1A],
                   p_ref[ROW_B1:ROW_B1 + 1, 0:HEADS1 * C1],
                   adj_bias,
                   head_masks=p_ref[ROW_MASK1:ROW_MASK1 + HEADS1, 0:W1A]),
        0.0)                                                              # (N, 16)

    # ---- conv2 (+ReLU). heads == 1 -> no lane masking needed.
    h2a = (jnp.dot(h1, p_ref[ROW_W2:ROW_W2 + HEADS1 * C1, 0:W2A],
                   preferred_element_type=f32)
           + p_ref[ROW_ONE2:ROW_ONE2 + 1, 0:W2A])                         # (N, 9)
    h2 = jnp.maximum(
        _gat_layer(h2a,
                   p_ref[ROW_AS2:ROW_AS2 + 1, 0:W2A],
                   p_ref[ROW_AD2:ROW_AD2 + 1, 0:W2A],
                   p_ref[ROW_B2:ROW_B2 + 1, 0:C2],
                   adj_bias),
        0.0)                                                              # (N, 8)

    # ---- x.view(-1, 80) @ fc1, without an in-kernel (N,8)->(G,80) relayout.
    # Reassociated so the K=128 matmul has G=2 rows instead of N=20.
    expanded = jnp.dot(h2, p_ref[ROW_REP:ROW_REP + C2, :],
                       preferred_element_type=f32)                        # (N, 128)
    t = expanded * p_ref[ROW_WEXP:ROW_WEXP + N, :]                        # (N, 128)
    m2 = jnp.dot(p_ref[ROW_SEG:ROW_SEG + NUM_GRAPHS, 0:N], t,
                 preferred_element_type=f32)                              # (G, 128)
    h3 = jnp.maximum(
        jnp.dot(m2, p_ref[ROW_FOLD:ROW_FOLD + C2 * FC1_HIDDEN, 0:FC1_HIDDEN],
                preferred_element_type=f32)
        + p_ref[ROW_FC1B:ROW_FC1B + 1, 0:FC1_HIDDEN], 0.0)                # (G, 16)

    # ---- fc2, emitted lane-dense (G, 128); wrapper slices [:, :NUM_CLASSES].
    out_ref[...] = (jnp.dot(h3, p_ref[ROW_FC2W:ROW_FC2W + FC1_HIDDEN, :],
                            preferred_element_type=f32)
                    + p_ref[ROW_FC2B:ROW_FC2B + 1, :])


def pack_params(params, adj):
    """One-time host-side packing of every weight/constant into (P_ROWS, 128)."""
    def head_block(att):
        att = np.asarray(att, np.float32)
        h, c = att.shape
        out = np.zeros((h, h * c), np.float32)
        for i in range(h):
            out[i, i * c:(i + 1) * c] = att[i]
        return out

    P = np.zeros((P_ROWS, 128), np.float32)

    def put(row, arr):
        arr = np.asarray(arr, np.float32)
        P[row:row + arr.shape[0], :arr.shape[1]] = arr

    put(ROW_W1, params["w1"])
    one1 = np.zeros((1, 128), np.float32); one1[0, HEADS1 * C1] = 1.0
    put(ROW_ONE1, one1)
    put(ROW_AS1, head_block(params["att_src1"]))
    put(ROW_AD1, head_block(params["att_dst1"]))
    put(ROW_B1, params["b1"])
    mask1 = np.zeros((HEADS1, 128), np.float32)
    for hd in range(HEADS1):
        mask1[hd, hd * C1:(hd + 1) * C1] = 1.0
        mask1[hd, HEADS1 * C1] = 1.0
    put(ROW_MASK1, mask1)
    put(ROW_W2, params["w2"])
    one2 = np.zeros((1, 128), np.float32); one2[0, C2] = 1.0
    put(ROW_ONE2, one2)
    put(ROW_AS2, params["att_src2"])
    put(ROW_AD2, params["att_dst2"])
    put(ROW_B2, params["b2"])
    rep = np.zeros((C2, 128), np.float32)
    for c in range(C2):
        rep[c, c * FC1_HIDDEN:(c + 1) * FC1_HIDDEN] = 1.0
    put(ROW_REP, rep)
    wexp = np.tile(np.asarray(params["fc1_w"], np.float32)
                   .reshape(NODES_PER_GRAPH, C2 * FC1_HIDDEN), (NUM_GRAPHS, 1))
    put(ROW_WEXP, wexp)
    fold = np.tile(np.eye(FC1_HIDDEN, dtype=np.float32), (C2, 1))          # (128, 16)
    put(ROW_FOLD, fold)
    seg = np.kron(np.eye(NUM_GRAPHS, dtype=np.float32),
                  np.ones((1, NODES_PER_GRAPH), np.float32))               # (G, N)
    put(ROW_SEG, seg)
    put(ROW_FC1B, params["fc1_b"])
    put(ROW_FC2W, params["fc2_w"])          # zero-padded to 128 output lanes
    put(ROW_FC2B, params["fc2_b"])
    adj_bias = np.where(np.asarray(adj) > 0, 0.0, MASK_BIAS).astype(np.float32)
    put(ROW_ADJB, adj_bias)
    return jnp.asarray(P)


@jax.jit
def gat_forward(x, packed):
    vmem = pltpu.MemorySpace.VMEM
    out_pad = pl.pallas_call(
        gat_fused_kernel,
        out_shape=jax.ShapeDtypeStruct((NUM_GRAPHS, OUT_PAD), jnp.float32),
        in_specs=[pl.BlockSpec(memory_space=vmem),
                  pl.BlockSpec(memory_space=vmem)],
        out_specs=pl.BlockSpec(memory_space=vmem),
    )(x, packed)
    return out_pad[:, :NUM_CLASSES]


def gat_reference(x, adj, params):
    """Pure-JAX reference (exact softmax) mirroring the PyTorch module."""
    def layer(xin, w, att_src, att_dst, bias):
        h = xin @ w
        heads, c = att_src.shape
        outs = []
        for hd in range(heads):
            hh = h[:, hd * c:(hd + 1) * c]
            e = (hh @ att_dst[hd])[:, None] + (hh @ att_src[hd])[None, :]
            e = jnp.where(e >= 0, e, NEG_SLOPE * e)
            e = jnp.where(adj > 0, e, MASK_BIAS)
            a = jax.nn.softmax(e, axis=1)
            outs.append(a @ hh)
        return jnp.concatenate(outs, axis=1) + bias

    h1 = jax.nn.relu(layer(x, params["w1"], params["att_src1"], params["att_dst1"], params["b1"]))
    h2 = jax.nn.relu(layer(h1, params["w2"], params["att_src2"], params["att_dst2"], params["b2"]))
    flat = h2.reshape(NUM_GRAPHS, NODES_PER_GRAPH * C2)
    h3 = jax.nn.relu(flat @ params["fc1_w"] + params["fc1_b"])
    return h3 @ params["fc2_w"] + params["fc2_b"]


def init_params(key):
    ks = jax.random.split(key, 12)
    scale = 0.1
    return {
        # conv1: GATConv(1, 8, heads=HEADS1)
        "w1": scale * jax.random.normal(ks[0], (1, HEADS1 * C1), jnp.float32),
        "att_src1": scale * jax.random.normal(ks[1], (HEADS1, C1), jnp.float32),
        "att_dst1": scale * jax.random.normal(ks[2], (HEADS1, C1), jnp.float32),
        "b1": scale * jax.random.normal(ks[3], (1, HEADS1 * C1), jnp.float32),
        # conv2: GATConv(8*HEADS1, 8, heads=1)
        "w2": scale * jax.random.normal(ks[4], (HEADS1 * C1, C2), jnp.float32),
        "att_src2": scale * jax.random.normal(ks[5], (1, C2), jnp.float32),
        "att_dst2": scale * jax.random.normal(ks[6], (1, C2), jnp.float32),
        "b2": scale * jax.random.normal(ks[7], (1, C2), jnp.float32),
        # fc1: Linear(80, 16), fc2: Linear(16, 3)   (stored (in, out))
        "fc1_w": scale * jax.random.normal(ks[8], (NODES_PER_GRAPH * C2, FC1_HIDDEN), jnp.float32),
        "fc1_b": scale * jax.random.normal(ks[9], (1, FC1_HIDDEN), jnp.float32),
        "fc2_w": scale * jax.random.normal(ks[10], (FC1_HIDDEN, NUM_CLASSES), jnp.float32),
        "fc2_b": scale * jax.random.normal(ks[11], (1, NUM_CLASSES), jnp.float32),
    }


def build_adjacency():
    # Deterministic graph: per graph of 10 nodes, a bidirectional ring, plus
    # self-loops (GATConv default add_self_loops=True).  Block-diagonal over
    # NUM_GRAPHS graphs.  adj[dst, src] = 1.
    adj = np.zeros((N, N), dtype=np.float32)
    for g in range(NUM_GRAPHS):
        base = g * NODES_PER_GRAPH
        for i in range(NODES_PER_GRAPH):
            j = (i + 1) % NODES_PER_GRAPH
            adj[base + i, base + j] = 1.0   # edge j -> i
            adj[base + j, base + i] = 1.0   # edge i -> j
            adj[base + i, base + i] = 1.0   # self-loop
    return jnp.asarray(adj)


if __name__ == "__main__":
    key = jax.random.PRNGKey(0)
    k_x, k_p = jax.random.split(key)
    x = jax.random.normal(k_x, (N, 1), jnp.float32)     # node features (in_channels=1)
    adj = build_adjacency()
    params = init_params(k_p)

    packed = pack_params(params, np.asarray(adj))       # one-time host-side prep
    out = gat_forward(x, packed)
    out = jax.block_until_ready(out)
    assert out.shape == (NUM_GRAPHS, NUM_CLASSES) and out.dtype == jnp.float32

    ref = gat_reference(x, adj, params)
    assert bool(jnp.all(jnp.isfinite(out)))
    assert jnp.allclose(out, ref, atol=2e-2, rtol=2e-2), (out, ref)
    print("KERNEL_OK")
</pallas_src>

<mosaic_0001>
module attributes {stable_mosaic.version = 11 : i64} {
  func.func @gat_fused_kernel(%arg0: memref<20x1xf32, #tpu.memory_space<vmem>>, %arg1: memref<320x128xf32, #tpu.memory_space<vmem>>, %arg2: memref<2x128xf32, #tpu.memory_space<vmem>>) attributes {dimension_semantics = [], scalar_prefetch = 0 : i64, scratch_operands = 0 : i64, tpu.core_type = #tpu.core_type<tc>} {
    %c296 = arith.constant 296 : index
    %c0 = arith.constant 0 : index
    %0 = vector.load %arg1[%c296, %c0] : memref<320x128xf32, #tpu.memory_space<vmem>>, vector<20x20xf32>
    %c0_0 = arith.constant 0 : index
    %c0_1 = arith.constant 0 : index
    %1 = vector.load %arg0[%c0_0, %c0_1] : memref<20x1xf32, #tpu.memory_space<vmem>>, vector<20x1xf32>
    %c0_2 = arith.constant 0 : index
    %c0_3 = arith.constant 0 : index
    %2 = vector.load %arg1[%c0_2, %c0_3] : memref<320x128xf32, #tpu.memory_space<vmem>>, vector<1x17xf32>
    %3 = vector.broadcast %1 : vector<20x1xf32> to vector<20x17xf32>
    %4 = vector.broadcast %2 : vector<1x17xf32> to vector<20x17xf32>
    %5 = arith.mulf %3, %4 : vector<20x17xf32>
    %c8 = arith.constant 8 : index
    %c0_4 = arith.constant 0 : index
    %6 = vector.load %arg1[%c8, %c0_4] : memref<320x128xf32, #tpu.memory_space<vmem>>, vector<1x17xf32>
    %7 = vector.broadcast %6 : vector<1x17xf32> to vector<20x17xf32>
    %8 = arith.addf %5, %7 : vector<20x17xf32>
    %c16 = arith.constant 16 : index
    %c0_5 = arith.constant 0 : index
    %9 = vector.load %arg1[%c16, %c0_5] : memref<320x128xf32, #tpu.memory_space<vmem>>, vector<2x17xf32>
    %c24 = arith.constant 24 : index
    %c0_6 = arith.constant 0 : index
    %10 = vector.load %arg1[%c24, %c0_6] : memref<320x128xf32, #tpu.memory_space<vmem>>, vector<2x17xf32>
    %c32 = arith.constant 32 : index
    %c0_7 = arith.constant 0 : index
    %11 = vector.load %arg1[%c32, %c0_7] : memref<320x128xf32, #tpu.memory_space<vmem>>, vector<1x16xf32>
    %c40 = arith.constant 40 : index
    %c0_8 = arith.constant 0 : index
    %12 = vector.load %arg1[%c40, %c0_8] : memref<320x128xf32, #tpu.memory_space<vmem>>, vector<2x17xf32>
    %cst = arith.constant dense<0.000000e+00> : vector<2x20xf32>
    %13 = tpu.matmul %9, %8, %cst {dimension_numbers = #tpu.dot_dimension_numbers<[1], [1], [0], [0], [0, 0, 1, 0], [], []>} : vector<2x17xf32>, vector<20x17xf32>, vector<2x20xf32> -> vector<2x20xf32>
    %cst_9 = arith.constant dense<0.000000e+00> : vector<20x2xf32>
    %14 = tpu.matmul %8, %10, %cst_9 {dimension_numbers = #tpu.dot_dimension_numbers<[1], [1], [0], [0], [0, 0, 1, 0], [], []>} : vector<20x17xf32>, vector<2x17xf32>, vector<20x2xf32> -> vector<20x2xf32>
    %cst_10 = arith.constant 0.000000e+00 : f32
    %15 = vector.broadcast %cst_10 : f32 to vector<20x16xf32>
    %16 = vector.extract_strided_slice %14 {offsets = [0, 0], sizes = [20, 1], strides = [1, 1]} : vector<20x2xf32> to vector<20x1xf32>
    %17 = vector.extract_strided_slice %13 {offsets = [0, 0], sizes = [1, 20], strides = [1, 1]} : vector<2x20xf32> to vector<1x20xf32>
    %18 = vector.broadcast %16 : vector<20x1xf32> to vector<20x20xf32>
    %19 = vector.broadcast %17 : vector<1x20xf32> to vector<20x20xf32>
    %20 = arith.addf %18, %19 : vector<20x20xf32>
    %cst_11 = arith.constant 0.000000e+00 : f32
    %21 = vector.broadcast %cst_11 : f32 to vector<20x20xf32>
    %22 = arith.cmpf oge, %20, %21 : vector<20x20xf32>
    %cst_12 = arith.constant 2.000000e-01 : f32
    %23 = vector.broadcast %cst_12 : f32 to vector<20x20xf32>
    %24 = arith.mulf %23, %20 : vector<20x20xf32>
    %25 = arith.select %22, %20, %24 : vector<20x20xi1>, vector<20x20xf32>
    %26 = arith.addf %25, %0 : vector<20x20xf32>
    %cst_13 = arith.constant dense<0xFF800000> : vector<20xf32>
    %27 = vector.multi_reduction <maximumf>, %26, %cst_13 [1] : vector<20x20xf32> to vector<20xf32>
    %28 = vector.shape_cast %27 : vector<20xf32> to vector<20x1xf32>
    %29 = vector.broadcast %28 : vector<20x1xf32> to vector<20x20xf32>
    %30 = arith.subf %26, %29 : vector<20x20xf32>
    %31 = math.exp %30 : vector<20x20xf32>
    %32 = vector.extract_strided_slice %12 {offsets = [0, 0], sizes = [1, 17], strides = [1, 1]} : vector<2x17xf32> to vector<1x17xf32>
    %33 = vector.broadcast %32 : vector<1x17xf32> to vector<20x17xf32>
    %34 = arith.mulf %8, %33 : vector<20x17xf32>
    %cst_14 = arith.constant dense<0.000000e+00> : vector<20x17xf32>
    %35 = tpu.matmul %31, %34, %cst_14 {dimension_numbers = #tpu.dot_dimension_numbers<[1], [0], [0], [1], [0, 0, 1, 1], [], []>} : vector<20x20xf32>, vector<20x17xf32>, vector<20x17xf32> -> vector<20x17xf32>
    %36 = vector.extract_strided_slice %35 {offsets = [0, 16], sizes = [20, 1], strides = [1, 1]} : vector<20x17xf32> to vector<20x1xf32>
    %37 = tpu.reciprocal %36 {approx = true} : vector<20x1xf32> -> vector<20x1xf32>
    %38 = vector.extract_strided_slice %35 {offsets = [0, 0], sizes = [20, 16], strides = [1, 1]} : vector<20x17xf32> to vector<20x16xf32>
    %39 = vector.broadcast %37 : vector<20x1xf32> to vector<20x16xf32>
    %40 = arith.mulf %39, %38 : vector<20x16xf32>
    %41 = arith.addf %15, %40 : vector<20x16xf32>
    %42 = vector.extract_strided_slice %14 {offsets = [0, 1], sizes = [20, 1], strides = [1, 1]} : vector<20x2xf32> to vector<20x1xf32>
    %43 = vector.extract_strided_slice %13 {offsets = [1, 0], sizes = [1, 20], strides = [1, 1]} : vector<2x20xf32> to vector<1x20xf32>
    %44 = vector.broadcast %42 : vector<20x1xf32> to vector<20x20xf32>
    %45 = vector.broadcast %43 : vector<1x20xf32> to vector<20x20xf32>
    %46 = arith.addf %44, %45 : vector<20x20xf32>
    %cst_15 = arith.constant 0.000000e+00 : f32
    %47 = vector.broadcast %cst_15 : f32 to vector<20x20xf32>
    %48 = arith.cmpf oge, %46, %47 : vector<20x20xf32>
    %cst_16 = arith.constant 2.000000e-01 : f32
    %49 = vector.broadcast %cst_16 : f32 to vector<20x20xf32>
    %50 = arith.mulf %49, %46 : vector<20x20xf32>
    %51 = arith.select %48, %46, %50 : vector<20x20xi1>, vector<20x20xf32>
    %52 = arith.addf %51, %0 : vector<20x20xf32>
    %cst_17 = arith.constant dense<0xFF800000> : vector<20xf32>
    %53 = vector.multi_reduction <maximumf>, %52, %cst_17 [1] : vector<20x20xf32> to vector<20xf32>
    %54 = vector.shape_cast %53 : vector<20xf32> to vector<20x1xf32>
    %55 = vector.broadcast %54 : vector<20x1xf32> to vector<20x20xf32>
    %56 = arith.subf %52, %55 : vector<20x20xf32>
    %57 = math.exp %56 : vector<20x20xf32>
    %58 = vector.extract_strided_slice %12 {offsets = [1, 0], sizes = [1, 17], strides = [1, 1]} : vector<2x17xf32> to vector<1x17xf32>
    %59 = vector.broadcast %58 : vector<1x17xf32> to vector<20x17xf32>
    %60 = arith.mulf %8, %59 : vector<20x17xf32>
    %cst_18 = arith.constant dense<0.000000e+00> : vector<20x17xf32>
    %61 = tpu.matmul %57, %60, %cst_18 {dimension_numbers = #tpu.dot_dimension_numbers<[1], [0], [0], [1], [0, 0, 1, 1], [], []>} : vector<20x20xf32>, vector<20x17xf32>, vector<20x17xf32> -> vector<20x17xf32>
    %62 = vector.extract_strided_slice %61 {offsets = [0, 16], sizes = [20, 1], strides = [1, 1]} : vector<20x17xf32> to vector<20x1xf32>
    %63 = tpu.reciprocal %62 {approx = true} : vector<20x1xf32> -> vector<20x1xf32>
    %64 = vector.extract_strided_slice %61 {offsets = [0, 0], sizes = [20, 16], strides = [1, 1]} : vector<20x17xf32> to vector<20x16xf32>
    %65 = vector.broadcast %63 : vector<20x1xf32> to vector<20x16xf32>
    %66 = arith.mulf %65, %64 : vector<20x16xf32>
    %67 = arith.addf %41, %66 : vector<20x16xf32>
    %68 = vector.broadcast %11 : vector<1x16xf32> to vector<20x16xf32>
    %69 = arith.addf %67, %68 : vector<20x16xf32>
    %cst_19 = arith.constant 0.000000e+00 : f32
    %70 = vector.broadcast %cst_19 : f32 to vector<20x16xf32>
    %71 = arith.maximumf %69, %70 : vector<20x16xf32>
    %c48 = arith.constant 48 : index
    %c0_20 = arith.constant 0 : index
    %72 = vector.load %arg1[%c48, %c0_20] : memref<320x128xf32, #tpu.memory_space<vmem>>, vector<16x9xf32>
    %cst_21 = arith.constant dense<0.000000e+00> : vector<20x9xf32>
    %73 = tpu.matmul %71, %72, %cst_21 {dimension_numbers = #tpu.dot_dimension_numbers<[1], [0], [0], [1], [0, 0, 1, 1], [], []>} : vector<20x16xf32>, vector<16x9xf32>, vector<20x9xf32> -> vector<20x9xf32>
    %c64 = arith.constant 64 : index
    %c0_22 = arith.constant 0 : index
    %74 = vector.load %arg1[%c64, %c0_22] : memref<320x128xf32, #tpu.memory_space<vmem>>, vector<1x9xf32>
    %75 = vector.broadcast %74 : vector<1x9xf32> to vector<20x9xf32>
    %76 = arith.addf %73, %75 : vector<20x9xf32>
    %c72 = arith.constant 72 : index
    %c0_23 = arith.constant 0 : index
    %77 = vector.load %arg1[%c72, %c0_23] : memref<320x128xf32, #tpu.memory_space<vmem>>, vector<1x9xf32>
    %c80 = arith.constant 80 : index
    %c0_24 = arith.constant 0 : index
    %78 = vector.load %arg1[%c80, %c0_24] : memref<320x128xf32, #tpu.memory_space<vmem>>, vector<1x9xf32>
    %c88 = arith.constant 88 : index
    %c0_25 = arith.constant 0 : index
    %79 = vector.load %arg1[%c88, %c0_25] : memref<320x128xf32, #tpu.memory_space<vmem>>, vector<1x8xf32>
    %cst_26 = arith.constant dense<0.000000e+00> : vector<1x20xf32>
    %80 = tpu.matmul %77, %76, %cst_26 {dimension_numbers = #tpu.dot_dimension_numbers<[1], [1], [0], [0], [0, 0, 1, 0], [], []>} : vector<1x9xf32>, vector<20x9xf32>, vector<1x20xf32> -> vector<1x20xf32>
    %cst_27 = arith.constant dense<0.000000e+00> : vector<20x1xf32>
    %81 = tpu.matmul %76, %78, %cst_27 {dimension_numbers = #tpu.dot_dimension_numbers<[1], [1], [0], [0], [0, 0, 1, 0], [], []>} : vector<20x9xf32>, vector<1x9xf32>, vector<20x1xf32> -> vector<20x1xf32>
    %cst_28 = arith.constant 0.000000e+00 : f32
    %82 = vector.broadcast %cst_28 : f32 to vector<20x8xf32>
    %83 = vector.broadcast %81 : vector<20x1xf32> to vector<20x20xf32>
    %84 = vector.broadcast %80 : vector<1x20xf32> to vector<20x20xf32>
    %85 = arith.addf %83, %84 : vector<20x20xf32>
    %cst_29 = arith.constant 0.000000e+00 : f32
    %86 = vector.broadcast %cst_29 : f32 to vector<20x20xf32>
    %87 = arith.cmpf oge, %85, %86 : vector<20x20xf32>
    %cst_30 = arith.constant 2.000000e-01 : f32
    %88 = vector.broadcast %cst_30 : f32 to vector<20x20xf32>
    %89 = arith.mulf %88, %85 : vector<20x20xf32>
    %90 = arith.select %87, %85, %89 : vector<20x20xi1>, vector<20x20xf32>
    %91 = arith.addf %90, %0 : vector<20x20xf32>
    %cst_31 = arith.constant dense<0xFF800000> : vector<20xf32>
    %92 = vector.multi_reduction <maximumf>, %91, %cst_31 [1] : vector<20x20xf32> to vector<20xf32>
    %93 = vector.shape_cast %92 : vector<20xf32> to vector<20x1xf32>
    %94 = vector.broadcast %93 : vector<20x1xf32> to vector<20x20xf32>
    %95 = arith.subf %91, %94 : vector<20x20xf32>
    %96 = math.exp %95 : vector<20x20xf32>
    %cst_32 = arith.constant dense<0.000000e+00> : vector<20x9xf32>
    %97 = tpu.matmul %96, %76, %cst_32 {dimension_numbers = #tpu.dot_dimension_numbers<[1], [0], [0], [1], [0, 0, 1, 1], [], []>} : vector<20x20xf32>, vector<20x9xf32>, vector<20x9xf32> -> vector<20x9xf32>
    %98 = vector.extract_strided_slice %97 {offsets = [0, 8], sizes = [20, 1], strides = [1, 1]} : vector<20x9xf32> to vector<20x1xf32>
    %99 = tpu.reciprocal %98 {approx = true} : vector<20x1xf32> -> vector<20x1xf32>
    %100 = vector.extract_strided_slice %97 {offsets = [0, 0], sizes = [20, 8], strides = [1, 1]} : vector<20x9xf32> to vector<20x8xf32>
    %101 = vector.broadcast %99 : vector<20x1xf32> to vector<20x8xf32>
    %102 = arith.mulf %101, %100 : vector<20x8xf32>
    %103 = arith.addf %82, %102 : vector<20x8xf32>
    %104 = vector.broadcast %79 : vector<1x8xf32> to vector<20x8xf32>
    %105 = arith.addf %103, %104 : vector<20x8xf32>
    %cst_33 = arith.constant 0.000000e+00 : f32
    %106 = vector.broadcast %cst_33 : f32 to vector<20x8xf32>
    %107 = arith.maximumf %105, %106 : vector<20x8xf32>
    %c96 = arith.constant 96 : index
    %c0_34 = arith.constant 0 : index
    %108 = vector.load %arg1[%c96, %c0_34] : memref<320x128xf32, #tpu.memory_space<vmem>>, vector<8x128xf32>
    %cst_35 = arith.constant dense<0.000000e+00> : vector<20x128xf32>
    %109 = tpu.matmul %107, %108, %cst_35 {dimension_numbers = #tpu.dot_dimension_numbers<[1], [0], [0], [1], [0, 0, 1, 1], [], []>} : vector<20x8xf32>, vector<8x128xf32>, vector<20x128xf32> -> vector<20x128xf32>
    %c104 = arith.constant 104 : index
    %c0_36 = arith.constant 0 : index
    %110 = vector.load %arg1[%c104, %c0_36] : memref<320x128xf32, #tpu.memory_space<vmem>>, vector<20x128xf32>
    %111 = arith.mulf %109, %110 : vector<20x128xf32>
    %c256 = arith.constant 256 : index
    %c0_37 = arith.constant 0 : index
    %112 = vector.load %arg1[%c256, %c0_37] : memref<320x128xf32, #tpu.memory_space<vmem>>, vector<2x20xf32>
    %cst_38 = arith.constant dense<0.000000e+00> : vector<2x128xf32>
    %113 = tpu.matmul %112, %111, %cst_38 {dimension_numbers = #tpu.dot_dimension_numbers<[1], [0], [0], [1], [0, 0, 1, 1], [], []>} : vector<2x20xf32>, vector<20x128xf32>, vector<2x128xf32> -> vector<2x128xf32>
    %c128 = arith.constant 128 : index
    %c0_39 = arith.constant 0 : index
    %114 = vector.load %arg1[%c128, %c0_39] : memref<320x128xf32, #tpu.memory_space<vmem>>, vector<128x16xf32>
    %cst_40 = arith.constant dense<0.000000e+00> : vector<2x16xf32>
    %115 = tpu.matmul %113, %114, %cst_40 {dimension_numbers = #tpu.dot_dimension_numbers<[1], [0], [0], [1], [0, 0, 1, 1], [], []>} : vector<2x128xf32>, vector<128x16xf32>, vector<2x16xf32> -> vector<2x16xf32>
    %c264 = arith.constant 264 : index
    %c0_41 = arith.constant 0 : index
    %116 = vector.load %arg1[%c264, %c0_41] : memref<320x128xf32, #tpu.memory_space<vmem>>, vector<1x16xf32>
    %117 = vector.broadcast %116 : vector<1x16xf32> to vector<2x16xf32>
    %118 = arith.addf %115, %117 : vector<2x16xf32>
    %cst_42 = arith.constant 0.000000e+00 : f32
    %119 = vector.broadcast %cst_42 : f32 to vector<2x16xf32>
    %120 = arith.maximumf %118, %119 : vector<2x16xf32>
    %c272 = arith.constant 272 : index
    %c0_43 = arith.constant 0 : index
    %121 = vector.load %arg1[%c272, %c0_43] : memref<320x128xf32, #tpu.memory_space<vmem>>, vector<16x128xf32>
    %cst_44 = arith.constant dense<0.000000e+00> : vector<2x128xf32>
    %122 = tpu.matmul %120, %121, %cst_44 {dimension_numbers = #tpu.dot_dimension_numbers<[1], [0], [0], [1], [0, 0, 1, 1], [], []>} : vector<2x16xf32>, vector<16x128xf32>, vector<2x128xf32> -> vector<2x128xf32>
    %c288 = arith.constant 288 : index
    %c0_45 = arith.constant 0 : index
    %123 = vector.load %arg1[%c288, %c0_45] : memref<320x128xf32, #tpu.memory_space<vmem>>, vector<1x128xf32>
    %124 = vector.broadcast %123 : vector<1x128xf32> to vector<2x128xf32>
    %125 = arith.addf %122, %124 : vector<2x128xf32>
    %c0_46 = arith.constant 0 : index
    %c0_47 = arith.constant 0 : index
    %126 = vector.load %arg2[%c0_46, %c0_47] : memref<2x128xf32, #tpu.memory_space<vmem>>, vector<2x128xf32>
    tpu.vector_store %arg2[%c0_46, %c0_47], %125 {strides = array<i32>} : memref<2x128xf32, #tpu.memory_space<vmem>>, vector<2x128xf32>,
    return
  }
}

</mosaic_0001>

<bundles_post_ra>
// kernel: gat_forward.1
= control target key start
LH: loop header
LB: loop body
LE: loop exit
PB: predicated region body
PF: predicated region fallthrough
CT: control target
= control target key end

     0   :  { %7 = vsyncpa [#allocation3], 0  ;;  %s1921_s0 = inlined_call_operand.vmem [shape: f32[20,1], index: 0, kind: input, shape index: {}]   ;;  %s1922_s1 = inlined_call_operand.hbm [shape: f32[320,128], index: 1, kind: input, shape index: {}]   ;;  %s1923_s2 = inlined_call_operand.hbm [shape: f32[2,128], index: 2, kind: output, shape index: {}]  }
   0x1   :  { %8 = vsyncpa [#allocation4], 0  ;;  %s1724_s9 = smov [#allocation2]   ;;  %s1676_s13 = scalar_lea.hbm %s1922_s1, 5120 }
   0x2   :  { %s16_s10 = sshll.u32 %s1724_s9, 4  ;;  %p1677_p0 = scmp.ne.s32.totalorder %s1922_s1, %s1676_s13  ;;  %s17_s10 = int_to_ptr.vmem [resolvable:$true] %s16_s10 }
   0x3   :  { %p1680_p1 = scmp.lt.u32.totalorder %s1676_s13, %s1922_s1 }
   0x5   :  { %p1682_p2 = pnand %p1680_p1, %p1677_p0 }
   0x7   :  { %1685 = shalt.err (!%p1682_p2)
}
   0x8   :  { %s1686_s18 = scalar_lea.vmem %s17_s10, 5120  ;;  %p1691_p4 = scmp.lt.s32.totalorder %s17_s10, %s17_s10 }
   0x9   :  { %p1687_p3 = scmp.ne.s32.totalorder %s17_s10, %s1686_s18  ;;  %p1692_p5 = scmp.lt.s32.totalorder %s1686_s18, %s1686_s18 }
   0xb   :  { %p1693_p6 = por %p1692_p5, %p1691_p4 }
   0xd   :  { %p1694_p7 = pnand %p1693_p6, %p1687_p3 }
   0xf   :  { %1697 = shalt.err (!%p1694_p7)
}
  0x10   :  { %s1725_s19 = smov 128   ;;  %s1726_s20 = smov 8  }
  0x11   :  { %22 = dma.hbm_to_vmem [thread:$0]  %s1922_s1, 5120, %s17_s10, [#allocation3], %s1725_s19, %s1725_s19, %s1726_s20  }
  0x12   :  { %1720 = dma.done.wait [#allocation3], 5120  }
  0x13   :  { %1721 = vsyncadd [#allocation3], 4294962176  ;;  %v1727_v0 = vmov 0   ;;  %v29_v1 = vld [vmem:[%s1921_s0] sm:$0xff]  ;;  %v31_v2 = vld [vmem:[%s1921_s0 + $0x10] sm:$0xf]  ;;  %v248_v6 = vlaneseq }
  0x14   :  { %1631 = vset.pattern.permute.xlu0 %v1727_v0  ;;  %1632 = vset.pattern.permute.xlu1 %v1727_v0  ;;  %v30_v3 = vld [vmem:[%s1921_s0 + $0x8] sm:$0xff]  ;;  %v1728_v4 = vmov 0.0|0.0   ;;  %vm1729_vm0 = vmmov 0   ;;  %v1730_v5 = vmov 0.0   ;;  %v1317_v8 = vld [vmem:[#allocation2] ss:$0 sm:$0xff] }
  0x15   :  { %35 = vperm.xlu0 %1631, %v29_v1   ;;  %45 = vperm.xlu1 %1632, %v31_v2   ;;  %v1779_v7 = vshrl.u32 %v248_v6, 7  ;;  %v66_v12 = vld [vmem:[#allocation2 + $0x28] sm:$0x3]  ;;  %vm67_vm1 = vcmask 138240   ;;  %vm303_vm3 = vcmask 1043456   ;;  %v1731_v35 = vmov 1  }
  0x16   :  { %1570 = vmatprep.subr.bf16.mxu0 %v1728_v4  ;;  %1574 = vmatprep.subr.bf16.mxu1 %v1728_v4  ;;  %v1318_v13 = vld [vmem:[#allocation2 + $0x8] ss:$0 sm:$0xff]  ;;  %vm1572_vm2 = vmpackc.low %vm67_vm1, %vm67_vm1  ;;  %v63_v29 = vld [vmem:[#allocation2 + $0x10] sm:$0x3]  ;;  %vm267_vm6 = vcmask 162816   ;;  %vm274_vm10 = vcmask 158720  }
  0x17   :  { %1427 = vmatprep.mubr.msk.f32.mxu0 %vm1729_vm0, %v1730_v5  ;;  %1447 = vmatprep.mubr.msk.f32.mxu1 %vm1729_vm0, %v1730_v5  ;;  %v1782_v10 = vsub.s32 0, %v1779_v7  ;;  %v425_v27 = vsub.s32 1, %v1779_v7  ;;  %v64_v30 = vld [vmem:[#allocation2 + $0x18] sm:$0x3]  ;;  %v1813_v50 = vld [vmem:[#allocation2 + $0x128] sm:$0xff]  ;;  %v1817_v60 = vld [vmem:[#allocation2 + $0x130] sm:$0xff] }
  0x18   :  { %vm600_vm12 = vcmask 130048   ;;  %vm693_vm13 = vcmask 72704   ;;  %vm789_vm15 = vcmask 68608   ;;  %s1734_s0 = smov [#allocation5]  }
  0x19   :  { %40 = vperm.xlu0 %1631, %v30_v3   ;;  %v290_v16 = vrot.slane %v66_v12, %v1782_v10  ;;  %v463_v28 = vrot.slane %v66_v12, %v425_v27  ;;  %vm1585_vm14 = vmpackc.low %vm693_vm13, %vm693_vm13  ;;  %s1308_s1 = sshll.u32 %s1734_s0, 4  ;;  %s1309_s1 = int_to_ptr.vmem [resolvable:$true] %s1308_s1 }
  0x1a   :  { %s1698_s29 = scalar_lea.vmem %s1309_s1, 32  ;;  %p1703_p9 = scmp.lt.s32.totalorder %s1309_s1, %s1309_s1 }
  0x1b   :  { %p1699_p8 = scmp.ne.s32.totalorder %s1309_s1, %s1698_s29  ;;  %p1704_p10 = scmp.lt.s32.totalorder %s1698_s29, %s1698_s29 }
  0x1d   :  { %1633 = vset.pattern.permute.xlu0 %v1731_v35  ;;  %p1705_p11 = por %p1704_p10, %p1703_p9 }
  0x1f   :  { %p1706_p12 = pnand %p1705_p11, %p1699_p8 }
  0x94   :  { %v36_v9 = vpop.permute.xlu0 %35  ;;  %v46_v14 = vpop.permute.xlu1 %45 }
  0x95   :  { %v52_v11 = vmul.f32 %v1317_v8, %v36_v9  ;;  %v54_v19 = vmul.f32 %v1317_v8, %v46_v14 }
  0x97   :  { %v60_v17 = vadd.f32 %v1318_v13, %v52_v11  ;;  %v62_v24 = vadd.f32 %v1318_v13, %v54_v19 }
  0x98   :  { %v41_v15 = vpop.permute.xlu0 %40 }
  0x99   :  { %v53_v18 = vmul.f32 %v1317_v8, %v41_v15  ;;  %v291_v22 = vmul.f32 %v290_v16, %v60_v17  ;;  %v293_v26 = vmul.f32 %v290_v16, %v62_v24  ;;  %v464_v32 = vmul.f32 %v463_v28, %v60_v17  ;;  %v1822_v8 = vld [vmem:[#allocation2 + $0x138] sm:$0xf] }
  0x9a   :  { %v466_v34 = vmul.f32 %v463_v28, %v62_v24 }
  0x9b   :  { %v61_v20 = vadd.f32 %v1318_v13, %v53_v18 }
  0x9d   :  { %v1571_v21 = vpack.c.bf16 %v61_v20, %v60_v17  ;;  %v292_v23 = vmul.f32 %v290_v16, %v61_v20  ;;  %v465_v31 = vmul.f32 %v463_v28, %v61_v20 }
  0x9f   :  { %1573 = vmatpush3.bf16.xpose.msk.msra.mxu0 %vm1572_vm2, %v1571_v21  ;;  %v1575_v25 = vpack.c.bf16 %v292_v23, %v291_v22  ;;  %v1578_v33 = vpack.c.bf16 %v465_v31, %v464_v32 }
  0xa0   :  { %1425 = vmatprep.subr.mxu0 %v1730_v5 }
  0xa1   :  { %1576 = vmatpush3.bf16.msra.mxu1 %v1575_v25 }
  0xa2   :  { %1445 = vmatprep.subr.mxu1 %v1730_v5 }
  0xa5   :  { %1446 = vmatpush3.msk.msra.mxu1 %vm303_vm3, %v293_v26 }
  0xa6   :  { %1580 = vmatprep.subr.bf16.mxu1 %v1728_v4 }
  0xa7   :  { %1426 = vmatpush3.xpose.msk.msra.mxu0 %vm67_vm1, %v62_v24 }
  0xa8   :  { %1430 = vmatprep.subr.mxu0 %v1730_v5 }
  0xaa   :  { %1428 = vmatmul.mubr.msk.f32.vlgmr.msra.gmra.mrb[0].mxu0 %vm67_vm1, %v63_v29 }
  0xab   :  { %1431 = vmatpush3.xpose.msk.msra.mxu0 %vm67_vm1, %v64_v30  ;;  %1432 = vmatprep.mubr.msk.f32.mxu0 %vm1729_vm0, %v1730_v5 }
  0xac   :  { %1577 = vmatprep.subr.bf16.mxu0 %v1728_v4 }
  0xae   :  { %1433 = vmatmul.mubr.msk.f32.vlgmr.msra.gmra.mrb[2].mxu0 %vm67_vm1, %v60_v17 }
  0xaf   :  { %1579 = vmatpush3.bf16.msra.mxu0 %v1578_v33  ;;  %1435 = vmatprep.mubr.msk.f32.mxu0 %vm1729_vm0, %v1730_v5 }
  0xb0   :  { %1460 = vmatprep.subr.mxu0 %v1730_v5 }
  0xb2   :  { %1436 = vmatmul.mubr.msk.f32.gmra.mrb[4].mxu0 %vm67_vm1, %v61_v20 }
  0xb3   :  { %1461 = vmatpush3.msk.msra.mxu0 %vm303_vm3, %v466_v34  ;;  %1438 = vmatprep.mubr.msk.f32.mxu0 %vm1729_vm0, %v1730_v5 }
  0xb4   :  { %1583 = vmatprep.subr.bf16.mxu0 %v1728_v4 }
  0xb6   :  { %1439 = vmatmul.mubr.msk.f32.gmra.mrb[6].mxu0 %vm67_vm1, %v62_v24 }
  0xb7   :  { %1462 = vmatprep.mubr.msk.f32.mxu0 %vm1729_vm0, %v1730_v5 }
 0x17d   :  { %v146_v36 = vpop.f32.mrb[0].mxu0 }
 0x17e   :  { %v1429_v37 = vpop.f32.mrb[1].mxu0  ;;  %v251_v44 = vrot.slane %v146_v36, %v1782_v10  ;;  %v426_v45 = vrot.slane %v146_v36, %v425_v27 }
 0x181   :  { %v219_v38 = vpop.f32.mrb[2].mxu0 }
 0x182   :  { %412 = vperm.xlu0 %1633, %v219_v38   ;;  %235 = vperm.xlu1 %1632, %v219_v38   ;;  %v1434_v39 = vpop.f32.mrb[3].mxu0 }
 0x185   :  { %v224_v40 = vpop.f32.mrb[4].mxu0 }
 0x186   :  { %240 = vperm.xlu1 %1632, %v224_v40   ;;  %v1437_v41 = vpop.f32.mrb[5].mxu0  ;;  %1635 = vset.pattern.permute.xlu0 %v1727_v0 }
 0x189   :  { %v229_v42 = vpop.f32.mrb[6].mxu0 }
 0x18a   :  { %1634 = vset.pattern.permute.xlu1 %v1731_v35  ;;  %245 = vperm.xlu0 %1635, %v229_v42   ;;  %v1440_v43 = vpop.f32.mrb[7].mxu0 }
 0x18b   :  { %416 = vperm.xlu1 %1634, %v224_v40  }
 0x18f   :  { %420 = vperm.xlu1 %1634, %v229_v42  }
 0x201   :  { %v413_v46 = vpop.permute.xlu0 %412  ;;  %v236_v47 = vpop.permute.xlu1 %235 }
 0x202   :  { %v427_v48 = vadd.f32 %v426_v45, %v413_v46  ;;  %v252_v49 = vadd.f32 %v251_v44, %v236_v47 }
 0x204   :  { %vm430_vm4 = vcmp.ge.f32.partialorder %v427_v48, 0.0  ;;  %v433_v51 = vmul.f32 0.2, %v427_v48  ;;  %vm255_vm5 = vcmp.ge.f32.partialorder %v252_v49, 0.0  ;;  %v258_v52 = vmul.f32 0.2, %v252_v49 }
 0x205   :  { %v241_v53 = vpop.permute.xlu1 %240 }
 0x206   :  { %v253_v54 = vadd.f32 %v251_v44, %v241_v53  ;;  %v436_v55 = vsel %vm430_vm4, %v427_v48, %v433_v51  ;;  %v261_v56 = vsel %vm255_vm5, %v252_v49, %v258_v52  ;;  %v1732_v48 = vmov 16  }
 0x207   :  { %v439_v57 = vadd.f32 %v436_v55, %v1813_v50  ;;  %v264_v58 = vadd.f32 %v261_v56, %v1813_v50  ;;  %1637 = vset.pattern.permute.xlu1 %v1732_v48  ;;  %1636 = vset.pattern.permute.xlu0 %v1732_v48  ;;  %vm956_vm5 = vcmask 64512  }
 0x208   :  { %vm256_vm7 = vcmp.ge.f32.partialorder %v253_v54, 0.0  ;;  %v259_v59 = vmul.f32 0.2, %v253_v54 }
 0x209   :  { %v246_v61 = vpop.permute.xlu0 %245  ;;  %v442_v62 = vsel %vm267_vm6, %v439_v57, -inf  ;;  %v268_v63 = vsel %vm267_vm6, %v264_v58, -inf }
 0x20a   :  { %v254_v0 = vadd.f32 %v251_v44, %v246_v61  ;;  %v417_v1 = vpop.permute.xlu1 %416  ;;  %443 = vmax.xlane.f32.xlu0 %v442_v62  ;;  %269 = vmax.xlane.f32.xlu1 %v268_v63  ;;  %v262_v2 = vsel %vm256_vm7, %v253_v54, %v259_v59 }
 0x20b   :  { %v428_v3 = vadd.f32 %v426_v45, %v417_v1  ;;  %v265_v6 = vadd.f32 %v262_v2, %v1817_v60  ;;  %v593_v1 = vld [vmem:[#allocation2 + $0x30] sm:$0xff]  ;;  %v594_v2 = vld [vmem:[#allocation2 + $0x38] sm:$0xff] }
 0x20c   :  { %vm257_vm8 = vcmp.ge.f32.partialorder %v254_v0, 0.0  ;;  %v260_v7 = vmul.f32 0.2, %v254_v0 }
 0x20d   :  { %vm431_vm9 = vcmp.ge.f32.partialorder %v428_v3, 0.0  ;;  %v434_v9 = vmul.f32 0.2, %v428_v3  ;;  %v271_v11 = vsel %vm267_vm6, %v265_v6, -inf }
 0x20e   :  { %v421_v12 = vpop.permute.xlu1 %420  ;;  %272 = vmax.xlane.f32.xlu0 %v271_v11  ;;  %v263_v13 = vsel %vm257_vm8, %v254_v0, %v260_v7 }
 0x20f   :  { %v429_v14 = vadd.f32 %v426_v45, %v421_v12  ;;  %v266_v15 = vadd.f32 %v263_v13, %v1822_v8  ;;  %v437_v16 = vsel %vm431_vm9, %v428_v3, %v434_v9 }
 0x210   :  { %v440_v17 = vadd.f32 %v437_v16, %v1817_v60  ;;  %v1335_v16 = vld [vmem:[#allocation2 + $0x20] ss:$0 sm:$0xff] }
 0x211   :  { %vm432_vm11 = vcmp.ge.f32.partialorder %v429_v14, 0.0  ;;  %v435_v18 = vmul.f32 0.2, %v429_v14  ;;  %v275_v19 = vsel %vm274_vm10, %v266_v15, -inf }
 0x212   :  { %276 = vmax.xlane.f32.xlu0 %v275_v19  ;;  %v445_v20 = vsel %vm267_vm6, %v440_v17, -inf }
 0x213   :  { %446 = vmax.xlane.f32.xlu1 %v445_v20  ;;  %v438_v21 = vsel %vm432_vm11, %v429_v14, %v435_v18 }
 0x214   :  { %v441_v22 = vadd.f32 %v438_v21, %v1822_v8 }
 0x216   :  { %v448_v23 = vsel %vm274_vm10, %v441_v22, -inf }
 0x217   :  { %449 = vmax.xlane.f32.xlu1 %v448_v23 }
 0x297   :  { %v444_v24 = vpop.xlane.xlu0 %443  ;;  %v270_v25 = vpop.xlane.xlu1 %269 }
 0x298   :  { %v451_v26 = vsub.f32 %v439_v57, %v444_v24  ;;  %v278_v27 = vsub.f32 %v264_v58, %v270_v25 }
 0x29a   :  { %v454_v28 = vmul.f32 1.442695, %v451_v26  ;;  %v281_v29 = vmul.f32 1.442695, %v278_v27 }
 0x29b   :  { %v273_v30 = vpop.xlane.xlu0 %272 }
 0x29c   :  { %1640 = vpow2.f32 %v454_v28  ;;  %v279_v31 = vsub.f32 %v265_v6, %v273_v30  ;;  %v1581_v6 = vpack.c.bf16 %v594_v2, %v593_v1 }
 0x29d   :  { %1642 = vpow2.f32 %v281_v29 }
 0x29e   :  { %v283_v32 = vmul.f32 1.442695, %v279_v31 }
 0x29f   :  { %v277_v33 = vpop.xlane.xlu0 %276 }
 0x2a0   :  { %1644 = vpow2.f32 %v283_v32  ;;  %v280_v34 = vsub.f32 %v266_v15, %v277_v33  ;;  %v447_v35 = vpop.xlane.xlu1 %446 }
 0x2a1   :  { %v452_v36 = vsub.f32 %v440_v17, %v447_v35 }
 0x2a2   :  { %v285_v37 = vmul.f32 1.442695, %v280_v34  ;;  %v1336_v34 = vld [vmem:[#allocation2 + $0x40] ss:$0 sm:$0xff] }
 0x2a3   :  { %v456_v38 = vmul.f32 1.442695, %v452_v36  ;;  %v1344_v36 = vld [vmem:[#allocation2 + $0x50] ss:$0 sm:$0xff] }
 0x2a4   :  { %1646 = vpow2.f32 %v285_v37  ;;  %v450_v39 = vpop.xlane.xlu1 %449 }
 0x2a5   :  { %1648 = vpow2.f32 %v456_v38  ;;  %v453_v40 = vsub.f32 %v441_v22, %v450_v39 }
 0x2a6   :  { %v1641_v41 = vpop.eup %1640 }
 0x2a7   :  { %v1643_v42 = vpop.eup %1642  ;;  %v458_v43 = vmul.f32 1.442695, %v453_v40  ;;  %1463 = vmatmul.mubr.msk.f32.vlgmr.msra.gmra.mrb[8].mxu0 %vm267_vm6, %v1641_v41 }
 0x2a8   :  { %1448 = vmatmul.mubr.msk.f32.vlgmr.msra.gmra.mrb[0].mxu1 %vm267_vm6, %v1643_v42  ;;  %1465 = vmatprep.mubr.msk.f32.mxu0 %vm1729_vm0, %v1730_v5 }
 0x2a9   :  { %1650 = vpow2.f32 %v458_v43  ;;  %1450 = vmatprep.mubr.msk.f32.mxu1 %vm1729_vm0, %v1730_v5  ;;  %1582 = vmatpush3.bf16.msra.mxu1 %v1581_v6 }
 0x2aa   :  { %v1645_v44 = vpop.eup %1644  ;;  %1508 = vmatprep.subr.mxu1 %v1730_v5 }
 0x2ac   :  { %1451 = vmatmul.mubr.msk.f32.gmra.mrb[2].mxu1 %vm267_vm6, %v1645_v44 }
 0x2ad   :  { %1453 = vmatprep.mubr.msk.f32.mxu1 %vm1729_vm0, %v1730_v5 }
 0x2ae   :  { %v1647_v45 = vpop.eup %1646 }
 0x2af   :  { %v1649_v46 = vpop.eup %1648 }
 0x2b0   :  { %1454 = vmatmul.mubr.msk.f32.gmra.mrb[4].mxu1 %vm267_vm6, %v1647_v45  ;;  %1466 = vmatmul.mubr.msk.f32.gmra.mrb[10].mxu0 %vm267_vm6, %v1649_v46 }
 0x2b1   :  { %1468 = vmatprep.mubr.msk.f32.mxu0 %vm1729_vm0, %v1730_v5  ;;  %1475 = vmatprep.mubr.msk.f32.mxu1 %vm1729_vm0, %v1730_v5 }
 0x2b3   :  { %v1651_v47 = vpop.eup %1650 }
 0x2b4   :  { %1469 = vmatmul.mubr.msk.f32.gmra.mrb[12].mxu0 %vm267_vm6, %v1651_v47 }
 0x2b5   :  { %1490 = vmatprep.mubr.msk.f32.mxu0 %vm1729_vm0, %v1730_v5 }
 0x37a   :  { %v545_v49 = vpop.f32.mrb[8].mxu0 }
 0x37b   :  { %v373_v51 = vpop.f32.mrb[0].mxu1  ;;  %1652 = vrcp.f32 %v545_v49  ;;  %v1464_v52 = vpop.f32.mrb[9].mxu0 }
 0x37c   :  { %1654 = vrcp.f32 %v373_v51  ;;  %v1449_v53 = vpop.f32.mrb[1].mxu1 }
 0x37d   :  { %v690_v53 = vld [vmem:[#allocation2 + $0x48] sm:$0x1] }
 0x37f   :  { %v378_v54 = vpop.f32.mrb[2].mxu1 }
 0x380   :  { %1656 = vrcp.f32 %v378_v54  ;;  %v1452_v55 = vpop.f32.mrb[3].mxu1 }
 0x383   :  { %v383_v56 = vpop.f32.mrb[4].mxu1  ;;  %v550_v57 = vpop.f32.mrb[10].mxu0 }
 0x384   :  { %v1455_v58 = vpop.f32.mrb[5].mxu1  ;;  %v1467_v59 = vpop.f32.mrb[11].mxu0  ;;  %1658 = vrcp.f32 %v550_v57 }
 0x385   :  { %v1653_v61 = vpop.eup %1652  ;;  %1660 = vrcp.f32 %v383_v56 }
 0x386   :  { %v1655_v62 = vpop.eup %1654  ;;  %564 = vperm.xlu1 %1637, %v1653_v61  }
 0x387   :  { %392 = vperm.xlu0 %1636, %v1655_v62   ;;  %v555_v63 = vpop.f32.mrb[12].mxu0 }
 0x388   :  { %v1470_v0 = vpop.f32.mrb[13].mxu0  ;;  %1662 = vrcp.f32 %v555_v63 }
 0x38a   :  { %v1657_v3 = vpop.eup %1656 }
 0x38b   :  { %397 = vperm.xlu1 %1637, %v1657_v3  }
 0x38e   :  { %v1659_v7 = vpop.eup %1658 }
 0x38f   :  { %569 = vperm.xlu1 %1637, %v1659_v7   ;;  %v1661_v9 = vpop.eup %1660 }
 0x392   :  { %v1663_v11 = vpop.eup %1662 }
 0x393   :  { %402 = vperm.xlu1 %1637, %v1661_v9  }
 0x397   :  { %574 = vperm.xlu1 %1637, %v1663_v11  }
 0x405   :  { %v565_v12 = vpop.permute.xlu1 %564 }
 0x406   :  { %v393_v13 = vpop.permute.xlu0 %392  ;;  %v577_v14 = vmul.f32 %v565_v12, %v545_v49 }
 0x407   :  { %v405_v15 = vmul.f32 %v393_v13, %v373_v51 }
 0x409   :  { %v580_v17 = vadd.f32 %v577_v14, %v405_v15 }
 0x40a   :  { %v398_v18 = vpop.permute.xlu1 %397 }
 0x40b   :  { %v587_v19 = vadd.f32 %v1335_v16, %v580_v17  ;;  %v406_v22 = vmul.f32 %v398_v18, %v378_v54 }
 0x40d   :  { %v590_v20 = vmax.f32 %v587_v19, 0.0 }
 0x40e   :  { %v570_v21 = vpop.permute.xlu1 %569 }
 0x40f   :  { %1476 = vmatmul.mubr.msk.f32.vlgmr.msra.gmra.mrb[6].mxu1 %vm600_vm12, %v590_v20  ;;  %v578_v23 = vmul.f32 %v570_v21, %v550_v57 }
 0x410   :  { %1478 = vmatprep.mubr.msk.f32.mxu1 %vm1729_vm0, %v1730_v5 }
 0x411   :  { %v581_v24 = vadd.f32 %v578_v23, %v406_v22 }
 0x412   :  { %v403_v25 = vpop.permute.xlu1 %402 }
 0x413   :  { %v588_v26 = vadd.f32 %v1335_v16, %v581_v24  ;;  %v407_v29 = vmul.f32 %v403_v25, %v383_v56  ;;  %v1733_v24 = vmov 8  }
 0x414   :  { %1638 = vset.pattern.permute.xlu0 %v1733_v24  ;;  %1639 = vset.pattern.permute.xlu1 %v1733_v24 }
 0x415   :  { %v591_v27 = vmax.f32 %v588_v26, 0.0 }
 0x416   :  { %v575_v28 = vpop.permute.xlu1 %574 }
 0x417   :  { %v579_v30 = vmul.f32 %v575_v28, %v555_v63  ;;  %1479 = vmatmul.mubr.msk.f32.gmra.mrb[8].mxu1 %vm600_vm12, %v591_v27 }
 0x418   :  { %1481 = vmatprep.mubr.msk.f32.mxu1 %vm1729_vm0, %v1730_v5 }
 0x419   :  { %v582_v31 = vadd.f32 %v579_v30, %v407_v29 }
 0x41b   :  { %v589_v32 = vadd.f32 %v1335_v16, %v582_v31 }
 0x41d   :  { %v592_v33 = vmax.f32 %v589_v32, 0.0 }
 0x41f   :  { %1482 = vmatmul.mubr.msk.f32.gmra.mrb[10].mxu1 %vm600_vm12, %v592_v33  ;;  %v955_v33 = vld [vmem:[#allocation2 + $0x60] sm:$0xff] }
 0x420   :  { %1510 = vmatprep.mubr.msk.f32.mxu1 %vm1729_vm0, %v1730_v5  ;;  %1509 = vmatpush3.msra.mxu1 %v955_v33 }
 0x421   :  { %1593 = vmatprep.subr.bf16.mxu1 %v1728_v4 }
 0x4e2   :  { %v676_v35 = vpop.f32.mrb[6].mxu1 }
 0x4e3   :  { %v677_v37 = vadd.f32 %v1336_v34, %v676_v35  ;;  %v1477_v38 = vpop.f32.mrb[7].mxu1  ;;  %v1349_v35 = vld [vmem:[#allocation2 + $0x58] ss:$0 sm:$0xff] }
 0x4e5   :  { %v780_v39 = vmul.f32 %v1344_v36, %v677_v37 }
 0x4e7   :  { %v783_v40 = vsel %vm693_vm13, %v780_v39, 0.0 }
 0x4e8   :  { %784 = vadd.xlane.f32.xlu1 %v783_v40 }
 0x4ea   :  { %v681_v41 = vpop.f32.mrb[8].mxu1 }
 0x4eb   :  { %v682_v42 = vadd.f32 %v1336_v34, %v681_v41  ;;  %v1480_v43 = vpop.f32.mrb[9].mxu1 }
 0x4ed   :  { %v1584_v44 = vpack.c.bf16 %v682_v42, %v677_v37  ;;  %v781_v45 = vmul.f32 %v1344_v36, %v682_v42 }
 0x4ef   :  { %1586 = vmatpush3.bf16.xpose.msk.msra.mxu0 %vm1585_vm14, %v1584_v44  ;;  %v786_v46 = vsel %vm693_vm13, %v781_v45, 0.0 }
 0x4f0   :  { %787 = vadd.xlane.f32.xlu0 %v786_v46  ;;  %1488 = vmatprep.subr.mxu0 %v1730_v5 }
 0x4f2   :  { %v686_v47 = vpop.f32.mrb[10].mxu1 }
 0x4f3   :  { %v687_v48 = vadd.f32 %v1336_v34, %v686_v47  ;;  %v1483_v49 = vpop.f32.mrb[11].mxu1 }
 0x4f4   :  { %v1130_v49 = vld [vmem:[#allocation2 + $0x88] sm:$0xff] }
 0x4f5   :  { %v782_v51 = vmul.f32 %v1344_v36, %v687_v48 }
 0x4f7   :  { %1489 = vmatpush3.xpose.msk.msra.mxu0 %vm693_vm13, %v687_v48  ;;  %v790_v52 = vsel %vm789_vm15, %v782_v51, 0.0  ;;  %v1131_v51 = vld [vmem:[#allocation2 + $0x90] sm:$0xff] }
 0x4f8   :  { %791 = vadd.xlane.f32.xlu1 %v790_v52  ;;  %1587 = vmatprep.subr.bf16.mxu0 %v1728_v4 }
 0x4fa   :  { %1491 = vmatmul.mubr.msk.f32.vlgmr.msra.gmra.mrb[14].mxu0 %vm693_vm13, %v690_v53  ;;  %v1132_v53 = vld [vmem:[#allocation2 + $0x98] sm:$0xff] }
 0x4fb   :  { %1589 = vmatpush3.bf16.msra.mxu0 %v1584_v44  ;;  %1499 = vmatprep.mubr.msk.f32.mxu0 %vm1729_vm0, %v1730_v5 }
 0x4fc   :  { %1497 = vmatprep.subr.mxu0 %v1730_v5 }
 0x4ff   :  { %1498 = vmatpush3.msk.msra.mxu0 %vm303_vm3, %v687_v48  ;;  %v1129_v48 = vld [vmem:[#allocation2 + $0x80] sm:$0xff] }
 0x500   :  { %1590 = vmatprep.subr.bf16.mxu0 %v1728_v4  ;;  %v1594_v52 = vpack.c.bf16 %v1130_v49, %v1129_v48 }
 0x575   :  { %v785_v54 = vpop.xlane.xlu1 %784 }
 0x57d   :  { %v788_v58 = vpop.xlane.xlu0 %787 }
 0x585   :  { %v792_v59 = vpop.xlane.xlu1 %791 }
 0x5cd   :  { %v772_v55 = vpop.f32.mrb[14].mxu0 }
 0x5ce   :  { %v796_v56 = vrot.slane %v772_v55, %v1782_v10  ;;  %v1492_v57 = vpop.f32.mrb[15].mxu0  ;;  %v1133_v55 = vld [vmem:[#allocation2 + $0xa0] sm:$0xff] }
 0x5d0   :  { %v797_v61 = vadd.f32 %v796_v56, %v785_v54  ;;  %v798_v62 = vadd.f32 %v796_v56, %v788_v58  ;;  %v799_v63 = vadd.f32 %v796_v56, %v792_v59  ;;  %v1597_v54 = vpack.c.bf16 %v1132_v53, %v1131_v51  ;;  %v1134_v56 = vld [vmem:[#allocation2 + $0xa8] sm:$0xff]  ;;  %v1135_v58 = vld [vmem:[#allocation2 + $0xb0] sm:$0xff]  ;;  %v1136_v59 = vld [vmem:[#allocation2 + $0xb8] sm:$0xff] }
 0x5d1   :  { %v1600_v57 = vpack.c.bf16 %v1134_v56, %v1133_v55 }
 0x5d2   :  { %vm801_vm1 = vcmp.ge.f32.partialorder %v798_v62, 0.0  ;;  %v804_v0 = vmul.f32 0.2, %v798_v62  ;;  %vm800_vm2 = vcmp.ge.f32.partialorder %v797_v61, 0.0  ;;  %v803_v1 = vmul.f32 0.2, %v797_v61 }
 0x5d3   :  { %vm802_vm4 = vcmp.ge.f32.partialorder %v799_v63, 0.0  ;;  %v805_v2 = vmul.f32 0.2, %v799_v63 }
 0x5d4   :  { %v807_v3 = vsel %vm801_vm1, %v798_v62, %v804_v0  ;;  %v806_v6 = vsel %vm800_vm2, %v797_v61, %v803_v1  ;;  %v1603_v61 = vpack.c.bf16 %v1136_v59, %v1135_v58  ;;  %v1137_v62 = vld [vmem:[#allocation2 + $0xc0] sm:$0xff]  ;;  %v1139_v1 = vld [vmem:[#allocation2 + $0xd0] sm:$0xff] }
 0x5d5   :  { %v810_v7 = vadd.f32 %v807_v3, %v1817_v60  ;;  %v809_v9 = vadd.f32 %v806_v6, %v1813_v50  ;;  %v808_v11 = vsel %vm802_vm4, %v799_v63, %v805_v2  ;;  %v1138_v63 = vld [vmem:[#allocation2 + $0xc8] sm:$0xff]  ;;  %v1140_v2 = vld [vmem:[#allocation2 + $0xd8] sm:$0xff]  ;;  %v1141_v6 = vld [vmem:[#allocation2 + $0xe0] sm:$0xff] }
 0x5d6   :  { %v811_v13 = vadd.f32 %v808_v11, %v1822_v8  ;;  %v1606_v0 = vpack.c.bf16 %v1138_v63, %v1137_v62  ;;  %v1609_v3 = vpack.c.bf16 %v1140_v2, %v1139_v1  ;;  %v1143_v11 = vld [vmem:[#allocation2 + $0xf0] sm:$0xff] }
 0x5d7   :  { %v815_v10 = vsel %vm267_vm6, %v810_v7, -inf  ;;  %v812_v12 = vsel %vm267_vm6, %v809_v9, -inf }
 0x5d8   :  { %816 = vmax.xlane.f32.xlu0 %v815_v10  ;;  %813 = vmax.xlane.f32.xlu1 %v812_v12  ;;  %v818_v14 = vsel %vm274_vm10, %v811_v13, -inf  ;;  %v1144_v10 = vld [vmem:[#allocation2 + $0xf8] sm:$0xff] }
 0x5d9   :  { %v1615_v12 = vpack.c.bf16 %v1144_v10, %v1143_v11 }
 0x5dc   :  { %819 = vmax.xlane.f32.xlu1 %v818_v14 }
 0x665   :  { %v817_v15 = vpop.xlane.xlu0 %816  ;;  %v814_v16 = vpop.xlane.xlu1 %813 }
 0x666   :  { %v821_v17 = vsub.f32 %v809_v9, %v814_v16  ;;  %v822_v18 = vsub.f32 %v810_v7, %v817_v15  ;;  %v1142_v7 = vld [vmem:[#allocation2 + $0xe8] sm:$0xff]  ;;  %v1047_v16 = vld [vmem:[#allocation2 + $0x70] sm:$0xff] }
 0x667   :  { %v1612_v9 = vpack.c.bf16 %v1142_v7, %v1141_v6  ;;  %v1046_v15 = vld [vmem:[#allocation2 + $0x68] sm:$0xff] }
 0x668   :  { %v824_v19 = vmul.f32 1.442695, %v821_v17  ;;  %v826_v20 = vmul.f32 1.442695, %v822_v18 }
 0x669   :  { %v820_v60 = vpop.xlane.xlu1 %819 }
 0x66a   :  { %1664 = vpow2.f32 %v824_v19  ;;  %v823_v50 = vsub.f32 %v811_v13, %v820_v60 }
 0x66b   :  { %1666 = vpow2.f32 %v826_v20 }
 0x66c   :  { %v828_v21 = vmul.f32 1.442695, %v823_v50 }
 0x66e   :  { %1668 = vpow2.f32 %v828_v21  ;;  %v1048_v21 = vld [vmem:[#allocation2 + $0x78] sm:$0xf] }
 0x674   :  { %v1665_v22 = vpop.eup %1664 }
 0x675   :  { %1500 = vmatmul.mubr.msk.f32.vlgmr.msra.gmra.mrb[16].mxu0 %vm267_vm6, %v1665_v22  ;;  %v1667_v8 = vpop.eup %1666 }
 0x676   :  { %1502 = vmatprep.mubr.msk.f32.mxu0 %vm1729_vm0, %v1730_v5 }
 0x678   :  { %v1669_v23 = vpop.eup %1668 }
 0x679   :  { %1503 = vmatmul.mubr.msk.f32.gmra.mrb[18].mxu0 %vm267_vm6, %v1667_v8 }
 0x67a   :  { %1505 = vmatprep.mubr.msk.f32.mxu0 %vm1729_vm0, %v1730_v5 }
 0x67d   :  { %1506 = vmatmul.mubr.msk.f32.gmra.mrb[20].mxu0 %vm267_vm6, %v1669_v23  ;;  %v1052_v23 = vld [vmem:[#allocation2 + $0x100] sm:$0x3] }
 0x67e   :  { %1525 = vmatprep.mubr.msk.f32.mxu0 %vm1729_vm0, %v1730_v5 }
 0x748   :  { %v907_v25 = vpop.f32.mrb[16].mxu0 }
 0x749   :  { %1670 = vrcp.f32 %v907_v25  ;;  %v1501_v26 = vpop.f32.mrb[17].mxu0 }
 0x74a   :  { %v1221_v26 = vld [vmem:[#allocation2 + $0x110] sm:$0xff] }
 0x74c   :  { %v912_v27 = vpop.f32.mrb[18].mxu0 }
 0x74d   :  { %1672 = vrcp.f32 %v912_v27  ;;  %v1504_v28 = vpop.f32.mrb[19].mxu0 }
 0x750   :  { %v917_v29 = vpop.f32.mrb[20].mxu0 }
 0x751   :  { %1674 = vrcp.f32 %v917_v29  ;;  %v1507_v30 = vpop.f32.mrb[21].mxu0 }
 0x753   :  { %v1671_v31 = vpop.eup %1670 }
 0x754   :  { %926 = vperm.xlu0 %1638, %v1671_v31  }
 0x757   :  { %v1673_v32 = vpop.eup %1672 }
 0x758   :  { %931 = vperm.xlu1 %1639, %v1673_v32  }
 0x75b   :  { %v1675_v34 = vpop.eup %1674 }
 0x75c   :  { %936 = vperm.xlu1 %1639, %v1675_v34   ;;  %v1356_v34 = vld [vmem:[#allocation2 + $0x120] ss:$0 sm:$0xff] }
 0x7d3   :  { %v927_v36 = vpop.permute.xlu0 %926 }
 0x7d4   :  { %v939_v37 = vmul.f32 %v927_v36, %v907_v25 }
 0x7d6   :  { %v949_v38 = vadd.f32 %v1349_v35, %v939_v37 }
 0x7d7   :  { %v932_v39 = vpop.permute.xlu1 %931 }
 0x7d8   :  { %v952_v40 = vmax.f32 %v949_v38, 0.0  ;;  %v940_v41 = vmul.f32 %v932_v39, %v912_v27  ;;  %v1222_v27 = vld [vmem:[#allocation2 + $0x118] sm:$0xff] }
 0x7d9   :  { %v1618_v28 = vpack.c.bf16 %v1222_v27, %v1221_v26 }
 0x7da   :  { %v950_v42 = vadd.f32 %v1349_v35, %v940_v41  ;;  %1511 = vmatmul.mubr.msk.f32.vlgmr.msra.gmra.mrb[12].mxu1 %vm956_vm5, %v952_v40 }
 0x7db   :  { %v937_v43 = vpop.permute.xlu1 %936  ;;  %1513 = vmatprep.mubr.msk.f32.mxu1 %vm1729_vm0, %v1730_v5  ;;  %1595 = vmatpush3.bf16.msra.mxu1 %v1594_v52 }
 0x7dc   :  { %v953_v44 = vmax.f32 %v950_v42, 0.0  ;;  %v941_v45 = vmul.f32 %v937_v43, %v917_v29  ;;  %1596 = vmatprep.subr.bf16.mxu1 %v1728_v4  ;;  %v1355_v29 = vld [vmem:[#allocation2 + $0x108] ss:$0 sm:$0xff] }
 0x7de   :  { %v951_v46 = vadd.f32 %v1349_v35, %v941_v45  ;;  %1514 = vmatmul.mubr.msk.f32.gmra.mrb[14].mxu1 %vm956_vm5, %v953_v44 }
 0x7df   :  { %1516 = vmatprep.mubr.msk.f32.mxu1 %vm1729_vm0, %v1730_v5  ;;  %1598 = vmatpush3.bf16.msra.mxu1 %v1597_v54 }
 0x7e0   :  { %v954_v47 = vmax.f32 %v951_v46, 0.0  ;;  %1599 = vmatprep.subr.bf16.mxu1 %v1728_v4 }
 0x7e2   :  { %1517 = vmatmul.mubr.msk.f32.gmra.mrb[16].mxu1 %vm956_vm5, %v954_v47 }
 0x7e3   :  { %1560 = vmatprep.mubr.msk.f32.mxu1 %vm1729_vm0, %v1730_v5  ;;  %1601 = vmatpush3.bf16.msra.mxu1 %v1600_v57 }
 0x7e4   :  { %1602 = vmatprep.subr.bf16.mxu1 %v1728_v4 }
 0x7e7   :  { %1604 = vmatpush3.bf16.msra.mxu1 %v1603_v61 }
 0x7e8   :  { %1605 = vmatprep.subr.bf16.mxu1 %v1728_v4 }
 0x7eb   :  { %1607 = vmatpush3.bf16.msra.mxu1 %v1606_v0 }
 0x7ec   :  { %1608 = vmatprep.subr.bf16.mxu1 %v1728_v4 }
 0x7ef   :  { %1610 = vmatpush3.bf16.msra.mxu1 %v1609_v3 }
 0x7f0   :  { %1611 = vmatprep.subr.bf16.mxu1 %v1728_v4 }
 0x7f3   :  { %1613 = vmatpush3.bf16.msra.mxu1 %v1612_v9 }
 0x7f4   :  { %1614 = vmatprep.subr.bf16.mxu1 %v1728_v4 }
 0x7f7   :  { %1616 = vmatpush3.bf16.msra.mxu1 %v1615_v12 }
 0x8ad   :  { %v1032_v13 = vpop.f32.mrb[12].mxu1 }
 0x8ae   :  { %v1512_v14 = vpop.f32.mrb[13].mxu1  ;;  %v1049_v18 = vmul.f32 %v1046_v15, %v1032_v13 }
 0x8b1   :  { %v1037_v17 = vpop.f32.mrb[14].mxu1 }
 0x8b2   :  { %v1050_v19 = vmul.f32 %v1047_v16, %v1037_v17  ;;  %v1515_v60 = vpop.f32.mrb[15].mxu1 }
 0x8b4   :  { %v1591_v20 = vpack.c.bf16 %v1050_v19, %v1049_v18 }
 0x8b5   :  { %v1042_v50 = vpop.f32.mrb[16].mxu1 }
 0x8b6   :  { %v1518_v22 = vpop.f32.mrb[17].mxu1  ;;  %1592 = vmatpush3.bf16.msra.mxu0 %v1591_v20  ;;  %v1051_v8 = vmul.f32 %v1048_v21, %v1042_v50 }
 0x8b7   :  { %1523 = vmatprep.subr.mxu0 %v1730_v5 }
 0x8ba   :  { %1524 = vmatpush3.msk.msra.mxu0 %vm303_vm3, %v1051_v8 }
 0x8bb   :  { %1526 = vmatmul.mubr.msk.f32.vlgmr.msra.gmra.mrb[22].mxu0 %vm267_vm6, %v1052_v23  ;;  %1617 = vmatprep.subr.bf16.mxu0 %v1728_v4 }
 0x8bc   :  { %1567 = vmatprep.mubr.msk.f32.mxu0 %vm1729_vm0, %v1730_v5  ;;  %1619 = vmatpush3.bf16.msra.mxu0 %v1618_v28 }
 0x98e   :  { %v1125_v24 = vpop.f32.mrb[22].mxu0 }
 0x98f   :  { %v1527_v25 = vpop.f32.mrb[23].mxu0  ;;  %1561 = vmatmul.mubr.f32.vlgmr.msra.gmra.mrb[18].mxu1 %v1125_v24 }
 0xa62   :  { %v1216_v30 = vpop.f32.mrb[18].mxu1 }
 0xa63   :  { %v1217_v31 = vadd.f32 %v1355_v29, %v1216_v30  ;;  %v1562_v32 = vpop.f32.mrb[19].mxu1 }
 0xa65   :  { %v1220_v33 = vmax.f32 %v1217_v31, 0.0 }
 0xa67   :  { %1568 = vmatmul.mubr.msk.f32.vlgmr.msra.gmra.mrb[24].mxu0 %vm600_vm12, %v1220_v33 }
 0xb3a   :  { %v1297_v4 = vpop.f32.mrb[24].mxu0 }
 0xb3b   :  { %v1298_v35 = vadd.f32 %v1356_v34, %v1297_v4  ;;  %v1569_v5 = vpop.f32.mrb[25].mxu0 }
 0xb3d   :  { %1301 = vst [vmem:[#allocation5] sm:$0x3] %v1298_v35 }
 0xb3e   :  { %1709 = shalt.err (!%p1706_p12)
}
 0xb3f   :  { %s1710_s4 = scalar_lea.hbm %s1923_s2, 32 }
 0xb40   :  { %p1711_p13 = scmp.ne.s32.totalorder %s1923_s2, %s1710_s4  ;;  %p1714_p0 = scmp.lt.u32.totalorder %s1710_s4, %s1923_s2 }
 0xb42   :  { %p1716_p1 = pnand %p1714_p0, %p1711_p13 }
 0xb44   :  { %1719 = shalt.err (!%p1716_p1)
}
 0xb45   :  { %1311 = dma.vmem_to_hbm [thread:$0]  %s1309_s1, 32, %s1923_s2, [#allocation4]  }
 0xb46   :  { %1722 = dma.done.wait [#allocation4], 32  }
 0xb47   :  { %1723 = vsyncadd [#allocation4], 4294967264 }
 0xb48   :  { %1315 = vsyncpa [#allocation3], 1 }
 0xb49   :  { %1316 = vsyncpa [#allocation4], 1 }

</bundles_post_ra>
